<compile_context>
chip_gen: v7x
topology: tpu7x:2x2x1
jax: 0.10.0
libtpu: 0.0.40
codegen_flags: <defaults>
</compile_context>

<pallas_src>
import functools

import numpy as np
import jax
import jax.numpy as jnp
from jax.experimental import pallas as pl
from jax.experimental.pallas import tpu as pltpu

FLOAT = jnp.float32
LANES = 128          # TPU vreg lane width
MAX_ROW_TILE = 1024  # rows per grid step for large inputs


def _round_up(x, m):
    return ((x + m - 1) // m) * m


# ---------------------------- Pallas kernel ----------------------------

def _mlp_kernel(x_ref, *refs, num_layers):
    """Fused MLP: h = x; for each layer: h = relu(h @ W + b). All on one row tile."""
    o_ref = refs[-1]
    # Cast on the VMEM tile (avoids a separate HBM cast pass in the wrapper).
    h = x_ref[...].astype(jnp.float32)
    for l in range(num_layers):
        w = refs[2 * l][...]          # (cin, cout_pad)  lane-dense, VMEM-resident
        b = refs[2 * l + 1][0, :]     # (cout_pad,)
        h = jnp.dot(h, w, preferred_element_type=jnp.float32) + b
        h = jnp.maximum(h, 0.0)       # nn.ReLU
    o_ref[...] = h.astype(o_ref.dtype)


# ---------------------------- wrapper ----------------------------

def value_encoder_forward(x, params):
    """x: (..., input_dim); params: list of (w (din, dout), b (dout,)) per layer."""
    orig_shape = x.shape
    din = orig_shape[-1]
    dout = params[-1][0].shape[1]
    n = int(np.prod(orig_shape[:-1]))
    x2 = x.reshape(n, din)            # no pad / no dtype cast of the activations here

    num_layers = len(params)

    # Pad the (tiny) weights/biases so every layer's output width is a multiple of
    # 128 lanes.  Zero padding keeps the math exact (see header comment).  Layer 0
    # keeps the native input width so x needs no HBM-side padding; only the very
    # first load/matmul carries narrow (din-wide) lanes.
    padded = []
    cin = din
    for (w, b) in params:
        ci, co = w.shape
        co_pad = _round_up(co, LANES)
        wp = jnp.zeros((cin, co_pad), FLOAT).at[:ci, :co].set(w.astype(FLOAT))
        bp = jnp.zeros((1, co_pad), FLOAT).at[0, :co].set(b.astype(FLOAT))
        padded.append((wp, bp))
        cin = co_pad
    dout_pad = cin

    # Row tiling: one grid step for small inputs (per-step pipeline overhead would
    # dominate), 1024-row tiles for large inputs.  Block row dims are either the
    # full row count or a multiple of 8, so the (8,128) constraint always holds.
    t = n if n <= MAX_ROW_TILE else MAX_ROW_TILE
    grid_rows = pl.cdiv(n, t)

    in_specs = [pl.BlockSpec((t, din), lambda i: (i, 0))]
    operands = [x2]
    for (wp, bp) in padded:
        ci, co = wp.shape
        in_specs.append(pl.BlockSpec((ci, co), lambda i: (0, 0)))   # weight: grid-invariant
        in_specs.append(pl.BlockSpec((1, co), lambda i: (0, 0)))    # bias:   grid-invariant
        operands.append(wp)
        operands.append(bp)

    out = pl.pallas_call(
        functools.partial(_mlp_kernel, num_layers=num_layers),
        out_shape=jax.ShapeDtypeStruct((n, dout_pad), x.dtype),
        grid=(grid_rows,),
        in_specs=in_specs,
        out_specs=pl.BlockSpec((t, dout_pad), lambda i: (i, 0)),
        compiler_params=pltpu.CompilerParams(
            # Only ask for cross-TC row sharding when there is real per-step work.
            dimension_semantics=(("parallel",) if grid_rows > 1 else ("arbitrary",)),
        ),
    )(*operands)

    # Strip the lane padding (cheap wrapper-side slice; in-kernel stores stay dense).
    return out[:, :dout].reshape(orig_shape[:-1] + (dout,))


# ---------------------------- pure-JAX reference ----------------------------

def value_encoder_ref(x, params):
    h = x
    for w, b in params:
        h = jax.nn.relu(h @ w + b)
    return h


# ---------------------------- deterministic parameter init ----------------------------

def init_params(key, input_dim, hidden_dim, num_layers=2):
    # Matches nn.Linear default init statistics (uniform(+-1/sqrt(fan_in))).
    dims = [(input_dim, hidden_dim)] + [(hidden_dim, hidden_dim)] * (num_layers - 1)
    keys = jax.random.split(key, num_layers)
    params = []
    for (din, dout), k in zip(dims, keys):
        kw, kb = jax.random.split(k)
        bound = 1.0 / np.sqrt(din)
        w = jax.random.uniform(kw, (din, dout), FLOAT, -bound, bound)   # stored as W^T
        b = jax.random.uniform(kb, (dout,), FLOAT, -bound, bound)
        params.append((w, b))
    return params


# ---------------------------- main ----------------------------

if __name__ == "__main__":
    key = jax.random.PRNGKey(0)
    kx, kp = jax.random.split(key)

    batch, seq, input_dim, hidden_dim, num_layers = 2, 8, 16, 32, 2
    x = jax.random.normal(kx, (batch, seq, input_dim), FLOAT)
    params = init_params(kp, input_dim, hidden_dim, num_layers)

    fwd = jax.jit(lambda xx: value_encoder_forward(xx, params))
    y = jax.block_until_ready(fwd(x))

    y_ref = jax.block_until_ready(value_encoder_ref(x, params))
    assert y.shape == (batch, seq, hidden_dim)
    assert bool(jnp.all(jnp.isfinite(y)))
    max_err = float(jnp.max(jnp.abs(y - y_ref)))
    assert max_err < 1e-4, f"mismatch vs reference: max abs err {max_err}"

    print("KERNEL_OK")
</pallas_src>

<mosaic_0001>
module attributes {stable_mosaic.version = 11 : i64} {
  func.func @_mlp_kernel(%arg0: i32, %arg1: memref<16x16xf32, #tpu.memory_space<vmem>>, %arg2: memref<16x128xf32, #tpu.memory_space<vmem>>, %arg3: memref<1x128xf32, #tpu.memory_space<vmem>>, %arg4: memref<128x128xf32, #tpu.memory_space<vmem>>, %arg5: memref<1x128xf32, #tpu.memory_space<vmem>>, %arg6: memref<16x128xf32, #tpu.memory_space<vmem>>) attributes {dimension_semantics = [#tpu.dimension_semantics<arbitrary>], iteration_bounds = array<i64: 1>, scalar_prefetch = 0 : i64, scratch_operands = 0 : i64, tpu.core_type = #tpu.core_type<tc>, window_params = [{transform_indices = @transform_0, window_bounds = array<i64: 16, 16>}, {pipeline_mode = #tpu.pipeline_mode<synchronous>, transform_indices = @transform_1, window_bounds = array<i64: 16, 128>}, {pipeline_mode = #tpu.pipeline_mode<synchronous>, transform_indices = @transform_2, window_bounds = array<i64: 1, 128>}, {pipeline_mode = #tpu.pipeline_mode<synchronous>, transform_indices = @transform_3, window_bounds = array<i64: 128, 128>}, {pipeline_mode = #tpu.pipeline_mode<synchronous>, transform_indices = @transform_4, window_bounds = array<i64: 1, 128>}, {transform_indices = @transform_5, window_bounds = array<i64: 16, 128>}]} {
    %c0 = arith.constant 0 : index
    %c0_0 = arith.constant 0 : index
    %0 = vector.load %arg1[%c0, %c0_0] : memref<16x16xf32, #tpu.memory_space<vmem>>, vector<16x16xf32>
    %c0_1 = arith.constant 0 : index
    %c0_2 = arith.constant 0 : index
    %1 = vector.load %arg2[%c0_1, %c0_2] : memref<16x128xf32, #tpu.memory_space<vmem>>, vector<16x128xf32>
    %c0_3 = arith.constant 0 : index
    %c0_4 = arith.constant 0 : index
    %2 = vector.load %arg3[%c0_3, %c0_4] : memref<1x128xf32, #tpu.memory_space<vmem>>, vector<1x128xf32>
    %3 = vector.shape_cast %2 : vector<1x128xf32> to vector<128xf32>
    %cst = arith.constant dense<0.000000e+00> : vector<16x128xf32>
    %4 = tpu.matmul %0, %1, %cst {dimension_numbers = #tpu.dot_dimension_numbers<[1], [0], [0], [1], [0, 0, 1, 1], [], []>} : vector<16x16xf32>, vector<16x128xf32>, vector<16x128xf32> -> vector<16x128xf32>
    %5 = vector.shape_cast %3 : vector<128xf32> to vector<1x128xf32>
    %6 = vector.broadcast %5 : vector<1x128xf32> to vector<16x128xf32>
    %7 = arith.addf %4, %6 : vector<16x128xf32>
    %cst_5 = arith.constant 0.000000e+00 : f32
    %8 = vector.broadcast %cst_5 : f32 to vector<16x128xf32>
    %9 = arith.maximumf %7, %8 : vector<16x128xf32>
    %c0_6 = arith.constant 0 : index
    %c0_7 = arith.constant 0 : index
    %10 = vector.load %arg4[%c0_6, %c0_7] : memref<128x128xf32, #tpu.memory_space<vmem>>, vector<128x128xf32>
    %c0_8 = arith.constant 0 : index
    %c0_9 = arith.constant 0 : index
    %11 = vector.load %arg5[%c0_8, %c0_9] : memref<1x128xf32, #tpu.memory_space<vmem>>, vector<1x128xf32>
    %12 = vector.shape_cast %11 : vector<1x128xf32> to vector<128xf32>
    %cst_10 = arith.constant dense<0.000000e+00> : vector<16x128xf32>
    %13 = tpu.matmul %9, %10, %cst_10 {dimension_numbers = #tpu.dot_dimension_numbers<[1], [0], [0], [1], [0, 0, 1, 1], [], []>} : vector<16x128xf32>, vector<128x128xf32>, vector<16x128xf32> -> vector<16x128xf32>
    %14 = vector.shape_cast %12 : vector<128xf32> to vector<1x128xf32>
    %15 = vector.broadcast %14 : vector<1x128xf32> to vector<16x128xf32>
    %16 = arith.addf %13, %15 : vector<16x128xf32>
    %cst_11 = arith.constant 0.000000e+00 : f32
    %17 = vector.broadcast %cst_11 : f32 to vector<16x128xf32>
    %18 = arith.maximumf %16, %17 : vector<16x128xf32>
    %c0_12 = arith.constant 0 : index
    %c0_13 = arith.constant 0 : index
    %19 = vector.load %arg6[%c0_12, %c0_13] : memref<16x128xf32, #tpu.memory_space<vmem>>, vector<16x128xf32>
    tpu.vector_store %arg6[%c0_12, %c0_13], %18 {strides = array<i32>} : memref<16x128xf32, #tpu.memory_space<vmem>>, vector<16x128xf32>,
    return
  }
  func.func @transform_0(%arg0: i32) -> (i32, i32) {
    %c0_i32 = arith.constant 0 : i32
    %c0_i32_0 = arith.constant 0 : i32
    return %arg0, %c0_i32 : i32, i32
  }
  func.func @transform_1(%arg0: i32) -> (i32, i32) {
    %c0_i32 = arith.constant 0 : i32
    %c0_i32_0 = arith.constant 0 : i32
    %c0_i32_1 = arith.constant 0 : i32
    return %c0_i32, %c0_i32_0 : i32, i32
  }
  func.func @transform_2(%arg0: i32) -> (i32, i32) {
    %c0_i32 = arith.constant 0 : i32
    %c0_i32_0 = arith.constant 0 : i32
    %c0_i32_1 = arith.constant 0 : i32
    return %c0_i32, %c0_i32_0 : i32, i32
  }
  func.func @transform_3(%arg0: i32) -> (i32, i32) {
    %c0_i32 = arith.constant 0 : i32
    %c0_i32_0 = arith.constant 0 : i32
    %c0_i32_1 = arith.constant 0 : i32
    return %c0_i32, %c0_i32_0 : i32, i32
  }
  func.func @transform_4(%arg0: i32) -> (i32, i32) {
    %c0_i32 = arith.constant 0 : i32
    %c0_i32_0 = arith.constant 0 : i32
    %c0_i32_1 = arith.constant 0 : i32
    return %c0_i32, %c0_i32_0 : i32, i32
  }
  func.func @transform_5(%arg0: i32) -> (i32, i32) {
    %c0_i32 = arith.constant 0 : i32
    %c0_i32_0 = arith.constant 0 : i32
    return %arg0, %c0_i32 : i32, i32
  }
}

</mosaic_0001>

<bundles_post_ra>
// kernel: _lambda_.1
= control target key start
LH: loop header
LB: loop body
LE: loop exit
PB: predicated region body
PF: predicated region fallthrough
CT: control target
= control target key end

     0   :  { %10 = vsyncpa [#allocation3], 0  ;;  %s367_s18 = smov [#allocation2]   ;;  %s438_s0 = inlined_call_operand.vmem [shape: f32[16,16], index: 0, kind: input, shape index: {}]   ;;  %s439_s1 = inlined_call_operand.vmem [shape: f32[16,128], index: 1, kind: input, shape index: {}]   ;;  %s440_s2 = inlined_call_operand.vmem [shape: f32[1,128], index: 2, kind: input, shape index: {}]   ;;  %s441_s3 = inlined_call_operand.hbm [shape: f32[128,128], index: 3, kind: input, shape index: {}]   ;;  %s442_s4 = inlined_call_operand.vmem [shape: f32[1,128], index: 4, kind: input, shape index: {}]   ;;  %s443_s5 = inlined_call_operand.vmem [shape: f32[16,128], index: 5, kind: output, shape index: {}]  }
   0x1   :  { %s22_s19 = sshll.u32 %s367_s18, 4  ;;  %s343_s22 = scalar_lea.hbm %s441_s3, 2048  ;;  %s23_s19 = int_to_ptr.vmem [resolvable:$true] %s22_s19 }
   0x2   :  { %p344_p0 = scmp.ne.s32.totalorder %s441_s3, %s343_s22  ;;  %p347_p1 = scmp.lt.u32.totalorder %s343_s22, %s441_s3 }
   0x4   :  { %p349_p2 = pnand %p347_p1, %p344_p0 }
   0x6   :  { %352 = shalt.err (!%p349_p2)
}
   0x7   :  { %s353_s27 = scalar_lea.vmem %s23_s19, 2048  ;;  %p358_p4 = scmp.lt.s32.totalorder %s23_s19, %s23_s19 }
   0x8   :  { %p354_p3 = scmp.ne.s32.totalorder %s23_s19, %s353_s27  ;;  %p359_p5 = scmp.lt.s32.totalorder %s353_s27, %s353_s27 }
   0xa   :  { %p360_p6 = por %p359_p5, %p358_p4 }
   0xc   :  { %p361_p7 = pnand %p360_p6, %p354_p3 }
   0xe   :  { %364 = shalt.err (!%p361_p7)
}
   0xf   :  { %s368_s28 = smov 128   ;;  %s369_s29 = smov 8  }
  0x10   :  { %28 = dma.hbm_to_vmem [thread:$0]  %s441_s3, 2048, %s23_s19, [#allocation3], %s368_s28, %s368_s28, %s369_s29  }
  0x11   :  { %365 = dma.done.wait [#allocation3], 2048  }
  0x12   :  { %366 = vsyncadd [#allocation3], 4294965248  ;;  %vm45_vm0 = vcmask 130048   ;;  %v36_v0 = vld [vmem:[%s439_s1] sm:$0xff]  ;;  %v37_v1 = vld [vmem:[%s439_s1 + $0x8] sm:$0xff] }
  0x13   :  { %v34_v2 = vld [vmem:[%s438_s0] sm:$0xff]  ;;  %v304_v3 = vpack.c.bf16 %v37_v1, %v36_v0  ;;  %v130_v5 = vld [vmem:[#allocation2 + $0x8] sm:$0xff]  ;;  %v131_v7 = vld [vmem:[#allocation2 + $0x10] sm:$0xff] }
  0x14   :  { %266 = vmatprep.mubr.msk.f32.mxu0 %vm45_vm0, %v34_v2  ;;  %v129_v4 = vld [vmem:[#allocation2] sm:$0xff]  ;;  %v132_v8 = vld [vmem:[#allocation2 + $0x18] sm:$0xff]  ;;  %v134_v11 = vld [vmem:[#allocation2 + $0x28] sm:$0xff] }
  0x15   :  { %v308_v6 = vpack.c.bf16 %v130_v5, %v129_v4  ;;  %305 = vmatprep.subr.bf16.mxu0 %v304_v3  ;;  %v312_v9 = vpack.c.bf16 %v132_v8, %v131_v7  ;;  %v133_v10 = vld [vmem:[#allocation2 + $0x20] sm:$0xff]  ;;  %v35_v12 = vld [vmem:[%s438_s0 + $0x8] sm:$0xff]  ;;  %v135_v14 = vld [vmem:[#allocation2 + $0x30] sm:$0xff] }
  0x16   :  { %307 = vmatpush3.bf16.msra.mxu0 %v304_v3  ;;  %v316_v13 = vpack.c.bf16 %v134_v11, %v133_v10  ;;  %v136_v15 = vld [vmem:[#allocation2 + $0x38] sm:$0xff]  ;;  %v137_v17 = vld [vmem:[#allocation2 + $0x40] sm:$0xff]  ;;  %v138_v18 = vld [vmem:[#allocation2 + $0x48] sm:$0xff] }
  0x17   :  { %309 = vmatprep.subr.bf16.mxu1 %v308_v6  ;;  %v320_v16 = vpack.c.bf16 %v136_v15, %v135_v14  ;;  %v324_v19 = vpack.c.bf16 %v138_v18, %v137_v17  ;;  %v139_v20 = vld [vmem:[#allocation2 + $0x50] sm:$0xff]  ;;  %v140_v21 = vld [vmem:[#allocation2 + $0x58] sm:$0xff]  ;;  %v141_v23 = vld [vmem:[#allocation2 + $0x60] sm:$0xff] }
  0x18   :  { %311 = vmatpush3.bf16.msra.mxu1 %v308_v6  ;;  %v328_v22 = vpack.c.bf16 %v140_v21, %v139_v20  ;;  %v142_v24 = vld [vmem:[#allocation2 + $0x68] sm:$0xff]  ;;  %v143_v26 = vld [vmem:[#allocation2 + $0x70] sm:$0xff]  ;;  %v144_v27 = vld [vmem:[#allocation2 + $0x78] sm:$0xff] }
  0x19   :  { %313 = vmatprep.subr.bf16.mxu1 %v312_v9  ;;  %267 = vmatmul.mubr.msk.f32.vlgmr.msra.gmra.mrb[0].mxu0 %vm45_vm0, %v35_v12  ;;  %v332_v25 = vpack.c.bf16 %v142_v24, %v141_v23  ;;  %v336_v28 = vpack.c.bf16 %v144_v27, %v143_v26  ;;  %v236_v29 = vld [vmem:[%s440_s2] ss:$0 sm:$0xff] }
  0x1a   :  { %v239_v36 = vld [vmem:[%s442_s4] ss:$0 sm:$0xff] }
  0x1c   :  { %315 = vmatpush3.bf16.msra.mxu1 %v312_v9 }
  0x1d   :  { %317 = vmatprep.subr.bf16.mxu1 %v316_v13 }
  0x20   :  { %319 = vmatpush3.bf16.msra.mxu1 %v316_v13 }
  0x21   :  { %321 = vmatprep.subr.bf16.mxu1 %v320_v16 }
  0x24   :  { %323 = vmatpush3.bf16.msra.mxu1 %v320_v16 }
  0x25   :  { %325 = vmatprep.subr.bf16.mxu1 %v324_v19 }
  0x28   :  { %327 = vmatpush3.bf16.msra.mxu1 %v324_v19 }
  0x29   :  { %329 = vmatprep.subr.bf16.mxu1 %v328_v22 }
  0x2c   :  { %331 = vmatpush3.bf16.msra.mxu1 %v328_v22 }
  0x2d   :  { %333 = vmatprep.subr.bf16.mxu1 %v332_v25 }
  0x30   :  { %335 = vmatpush3.bf16.msra.mxu1 %v332_v25 }
  0x31   :  { %337 = vmatprep.subr.bf16.mxu1 %v336_v28 }
  0x34   :  { %339 = vmatpush3.bf16.msra.mxu1 %v336_v28 }
  0xec   :  { %v268_v30 = vpop.f32.mrb[0].mxu0 }
  0xed   :  { %v124_v31 = vadd.f32 %v268_v30, %v236_v29  ;;  %v118_v32 = vpop.f32.mrb[1].mxu0 }
  0xee   :  { %v119_v33 = vadd.f32 %v236_v29, %v118_v32 }
  0xef   :  { %v128_v35 = vmax.f32 %v124_v31, 0.0 }
  0xf0   :  { %v127_v34 = vmax.f32 %v119_v33, 0.0 }
  0xf2   :  { %301 = vmatprep.mubr.f32.mxu1 %v127_v34 }
  0xf3   :  { %302 = vmatmul.mubr.f32.vlgmr.msra.gmra.mrb[0].mxu1 %v128_v35 }
 0x1c6   :  { %v303_v37 = vpop.f32.mrb[0].mxu1 }
 0x1c7   :  { %v224_v38 = vadd.f32 %v303_v37, %v239_v36  ;;  %v218_v39 = vpop.f32.mrb[1].mxu1 }
 0x1c8   :  { %v219_v40 = vadd.f32 %v239_v36, %v218_v39 }
 0x1c9   :  { %v228_v41 = vmax.f32 %v224_v38, 0.0 }
 0x1ca   :  { %v227_v42 = vmax.f32 %v219_v40, 0.0 }
 0x1cb   :  { %230 = vst [vmem:[%s443_s5 + $0x8] sm:$0xff] %v228_v41 }
 0x1cc   :  { %229 = vst [vmem:[%s443_s5] sm:$0xff] %v227_v42 }
 0x1cd   :  { %235 = vsyncpa [#allocation3], 1 }

</bundles_post_ra>
